<compile_context>
chip_gen: v5e
topology: v5e:2x2
jax: 0.10.0
libtpu: 0.0.40
codegen_flags: <defaults>
</compile_context>

<pallas_src>
import functools
import math

import jax
import jax.numpy as jnp
from jax import lax
from jax.experimental import pallas as pl
from jax.experimental.pallas import tpu as pltpu


def _round_up(x, m):
    return ((x + m - 1) // m) * m


def _label_smoothing_kernel(tgt_ref, x_ref, out_ref, *,
                            tile_v, vocab, padding_idx,
                            confidence, smooth_val, entropy):
    """Accumulates per-row KL(true_dist || exp(x)) partial sums over vocab tiles."""
    j = pl.program_id(1)                                    # vocab-tile index

    # Upcast per tile (input may be bf16 in HBM); all accumulation stays f32.
    x = x_ref[...].astype(jnp.float32)                      # (TN, TV)
    tgt = tgt_ref[...]                                      # (TN, 1) int32
    valid = (tgt != padding_idx).astype(jnp.float32)        # (TN, 1) row mask

    lane = lax.broadcasted_iota(jnp.int32, x.shape, 1)      # lane-local column idx

    # Ragged vocab edge: zero out-of-range lanes.  Emitted only when needed
    # (trace-time condition), and as a select on x so garbage (possibly NaN)
    # padding data never reaches the arithmetic.
    if vocab % tile_v != 0:
        limit = vocab - j * tile_v
        x = jnp.where(lane < limit, x, jnp.float32(0.0))

    # Weight: confidence at the target column of this tile, smooth_val elsewhere.
    # (The padding column gets corrected analytically below.)
    tgt_local = tgt - j * tile_v                            # (TN, 1)
    w = jnp.where(lane == tgt_local,
                  jnp.float32(confidence), jnp.float32(smooth_val))

    cross = jnp.sum(w * x, axis=-1, keepdims=True)          # (TN, 1)  sum_v w*x

    @pl.when(j == 0)
    def _init():
        # Per-row constant  sum_v t*log(t)  -- applied exactly once per row.
        out_ref[...] = valid * jnp.float32(entropy)

    out_ref[...] = out_ref[...] - valid * cross

    # The padding column's true weight is 0, but it was counted with smooth_val
    # in `cross`.  padding_idx is static, so fix it on the single tile that
    # contains it with a static column slice (no per-element compare).
    pad_tile = padding_idx // tile_v
    pad_col = padding_idx % tile_v

    @pl.when(j == pad_tile)
    def _fix_pad_col():
        out_ref[...] = out_ref[...] + valid * (
            jnp.float32(smooth_val) * x[:, pad_col:pad_col + 1])


def label_smoothing_loss(x, target, *, size, padding_idx, smoothing,
                         block_rows=512, block_cols=2048):
    """x: [N, size] log-probs (f32 or bf16); target: [N] ints. Returns scalar f32."""
    n, v = x.shape
    assert v == size
    assert 0 <= padding_idx < size

    confidence = 1.0 - smoothing
    smooth_val = smoothing / (size - 2)
    # Trace-time per-row entropy term (0*log(0) := 0 convention).
    s_logs = smooth_val * math.log(smooth_val) if smooth_val > 0.0 else 0.0
    c_logc = confidence * math.log(confidence) if confidence > 0.0 else 0.0
    entropy = (size - 2) * s_logs + c_logc

    # Vocab tile: multiple of 128, or the full (possibly small) vocab.
    if v > block_cols:
        assert block_cols % 128 == 0
        tv = block_cols
    else:
        tv = v

    # Row tile: multiple of 8, or the full row count.  Give the 'parallel' row
    # axis >=2 blocks when rows allow so both v7x TensorCores stay busy.
    if n > block_rows:
        assert block_rows % 8 == 0
        tn = block_rows
    elif n >= 16:
        tn = _round_up(-(-n // 2), 8)   # >=2 row blocks, multiple of 8, <= n
    else:
        tn = n

    grid = (pl.cdiv(n, tn), pl.cdiv(v, tv))

    tgt2d = target.astype(jnp.int32).reshape(n, 1)

    kernel = functools.partial(
        _label_smoothing_kernel,
        tile_v=tv, vocab=v, padding_idx=padding_idx,
        confidence=confidence, smooth_val=smooth_val, entropy=entropy)

    row_losses = pl.pallas_call(
        kernel,
        out_shape=jax.ShapeDtypeStruct((n, 1), jnp.float32),
        grid_spec=pltpu.PrefetchScalarGridSpec(
            num_scalar_prefetch=0,
            grid=grid,
            in_specs=[
                pl.BlockSpec((tn, 1), lambda i, j: (i, 0)),    # targets
                pl.BlockSpec((tn, tv), lambda i, j: (i, j)),   # x tile (native dtype)
            ],
            out_specs=pl.BlockSpec((tn, 1), lambda i, j: (i, 0)),  # per-row acc
        ),
        compiler_params=pltpu.CompilerParams(
            dimension_semantics=("parallel", "arbitrary")),
        cost_estimate=pl.CostEstimate(
            flops=4 * n * v,
            transcendentals=0,
            bytes_accessed=x.dtype.itemsize * n * v + 8 * n),
    )(tgt2d, x)

    # Second-stage (tree) reduction of per-row losses to the scalar.
    return jnp.sum(row_losses)


def _reference(x, target, *, size, padding_idx, smoothing):
    """Pure-JAX replica of the PyTorch forward (sanity check)."""
    n, v = x.shape
    confidence = 1.0 - smoothing
    smooth_val = smoothing / (size - 2)
    true_dist = jnp.full((n, v), smooth_val, jnp.float32)
    true_dist = true_dist.at[jnp.arange(n), target].set(confidence)
    true_dist = true_dist.at[:, padding_idx].set(0.0)
    true_dist = jnp.where((target == padding_idx)[:, None], 0.0, true_dist)
    safe_t = jnp.where(true_dist > 0, true_dist, 1.0)
    xf = x.astype(jnp.float32)
    return jnp.sum(jnp.where(true_dist > 0,
                             true_dist * (jnp.log(safe_t) - xf), 0.0))


if __name__ == "__main__":
    PADDING_IDX = 0
    SMOOTHING = 0.1

    def run_case(n, size, block_rows, block_cols, key):
        kx, kt = jax.random.split(key)
        logits = jax.random.normal(kx, (n, size), dtype=jnp.float32)
        x = jax.nn.log_softmax(logits, axis=-1)      # KLDivLoss expects log-probs
        target = jax.random.randint(kt, (n,), 0, size, dtype=jnp.int32)
        target = target.at[min(3, n - 1)].set(PADDING_IDX)   # padding-row path
        loss = label_smoothing_loss(x, target, size=size,
                                    padding_idx=PADDING_IDX,
                                    smoothing=SMOOTHING,
                                    block_rows=block_rows,
                                    block_cols=block_cols)
        loss = jax.block_until_ready(loss)
        ref = _reference(x, target, size=size, padding_idx=PADDING_IDX,
                         smoothing=SMOOTHING)
        assert jnp.allclose(loss, ref, rtol=1e-4, atol=1e-4), (n, size, loss, ref)

    key = jax.random.PRNGKey(0)
    k1, k2 = jax.random.split(key)

    # Small case at module-consistent shapes (single tile, divisible).
    run_case(8, 32, 512, 2048, k1)
    # Ragged rows + ragged vocab tiles (exercises in-kernel edge masking).
    run_case(10, 200, 8, 128, k2)

    print("KERNEL_OK")
</pallas_src>

<mosaic_0001>
module attributes {stable_mosaic.version = 11 : i64} {
  func.func @_label_smoothing_kernel(%arg0: i32, %arg1: i32, %arg2: memref<8x1xi32, #tpu.memory_space<vmem>>, %arg3: memref<8x32xf32, #tpu.memory_space<vmem>>, %arg4: memref<8x1xf32, #tpu.memory_space<vmem>>) attributes {dimension_semantics = [#tpu.dimension_semantics<parallel>, #tpu.dimension_semantics<arbitrary>], iteration_bounds = array<i64: 1, 1>, scalar_prefetch = 0 : i64, scratch_operands = 0 : i64, tpu.core_type = #tpu.core_type<tc>, window_params = [{transform_indices = @transform_0, window_bounds = array<i64: 8, 1>}, {transform_indices = @transform_1, window_bounds = array<i64: 8, 32>}, {transform_indices = @transform_2, window_bounds = array<i64: 8, 1>}]} {
    %c0 = arith.constant 0 : index
    %c0_0 = arith.constant 0 : index
    %0 = vector.load %arg3[%c0, %c0_0] : memref<8x32xf32, #tpu.memory_space<vmem>>, vector<8x32xf32>
    %c0_1 = arith.constant 0 : index
    %c0_2 = arith.constant 0 : index
    %1 = vector.load %arg2[%c0_1, %c0_2] : memref<8x1xi32, #tpu.memory_space<vmem>>, vector<8x1xi32>
    %c0_i32 = arith.constant 0 : i32
    %2 = vector.broadcast %c0_i32 : i32 to vector<8x1xi32>
    %3 = arith.cmpi ne, %1, %2 : vector<8x1xi32>
    %4 = arith.extui %3 : vector<8x1xi1> to vector<8x1xi32>
    %5 = arith.sitofp %4 : vector<8x1xi32> to vector<8x1xf32>
    %6 = tpu.iota {dimensions = array<i32: 1>} : vector<8x32xi32>
    %c32_i32 = arith.constant 32 : i32
    %7 = arith.muli %arg1, %c32_i32 : i32
    %8 = vector.broadcast %7 : i32 to vector<8x1xi32>
    %9 = arith.subi %1, %8 : vector<8x1xi32>
    %10 = vector.broadcast %9 : vector<8x1xi32> to vector<8x32xi32>
    %11 = arith.cmpi eq, %6, %10 : vector<8x32xi32>
    %cst = arith.constant 0.899999976 : f32
    %cst_3 = arith.constant 0.00333333341 : f32
    %12 = vector.broadcast %cst : f32 to vector<8x32xf32>
    %13 = vector.broadcast %cst_3 : f32 to vector<8x32xf32>
    %14 = arith.select %11, %12, %13 : vector<8x32xi1>, vector<8x32xf32>
    %15 = arith.mulf %14, %0 : vector<8x32xf32>
    %cst_4 = arith.constant dense<0.000000e+00> : vector<8xf32>
    %16 = vector.multi_reduction <add>, %15, %cst_4 [1] : vector<8x32xf32> to vector<8xf32>
    %17 = vector.shape_cast %16 : vector<8xf32> to vector<8x1xf32>
    %c0_i32_5 = arith.constant 0 : i32
    %18 = arith.cmpi eq, %arg1, %c0_i32_5 : i32
    %19 = arith.extui %18 : i1 to i32
    %c0_i32_6 = arith.constant 0 : i32
    %20 = arith.cmpi ne, %19, %c0_i32_6 : i32
    scf.if %20 {
      %cst_13 = arith.constant -0.665202737 : f32
      %28 = vector.broadcast %cst_13 : f32 to vector<8x1xf32>
      %29 = arith.mulf %5, %28 : vector<8x1xf32>
      %c0_14 = arith.constant 0 : index
      %c0_15 = arith.constant 0 : index
      %30 = vector.load %arg4[%c0_14, %c0_15] : memref<8x1xf32, #tpu.memory_space<vmem>>, vector<8x1xf32>
      tpu.vector_store %arg4[%c0_14, %c0_15], %29 {strides = array<i32>} : memref<8x1xf32, #tpu.memory_space<vmem>>, vector<8x1xf32>,
    } else {
    }
    %c0_7 = arith.constant 0 : index
    %c0_8 = arith.constant 0 : index
    %21 = vector.load %arg4[%c0_7, %c0_8] : memref<8x1xf32, #tpu.memory_space<vmem>>, vector<8x1xf32>
    %22 = arith.mulf %5, %17 : vector<8x1xf32>
    %23 = arith.subf %21, %22 : vector<8x1xf32>
    %c0_9 = arith.constant 0 : index
    %c0_10 = arith.constant 0 : index
    %24 = vector.load %arg4[%c0_9, %c0_10] : memref<8x1xf32, #tpu.memory_space<vmem>>, vector<8x1xf32>
    tpu.vector_store %arg4[%c0_9, %c0_10], %23 {strides = array<i32>} : memref<8x1xf32, #tpu.memory_space<vmem>>, vector<8x1xf32>,
    %c0_i32_11 = arith.constant 0 : i32
    %25 = arith.cmpi eq, %arg1, %c0_i32_11 : i32
    %26 = arith.extui %25 : i1 to i32
    %c0_i32_12 = arith.constant 0 : i32
    %27 = arith.cmpi ne, %26, %c0_i32_12 : i32
    scf.if %27 {
      %c0_13 = arith.constant 0 : index
      %c0_14 = arith.constant 0 : index
      %28 = vector.load %arg4[%c0_13, %c0_14] : memref<8x1xf32, #tpu.memory_space<vmem>>, vector<8x1xf32>
      %29 = vector.extract_strided_slice %0 {offsets = [0, 0], sizes = [8, 1], strides = [1, 1]} : vector<8x32xf32> to vector<8x1xf32>
      %cst_15 = arith.constant 0.00333333341 : f32
      %30 = vector.broadcast %cst_15 : f32 to vector<8x1xf32>
      %31 = arith.mulf %30, %29 : vector<8x1xf32>
      %32 = arith.mulf %5, %31 : vector<8x1xf32>
      %33 = arith.addf %28, %32 : vector<8x1xf32>
      %c0_16 = arith.constant 0 : index
      %c0_17 = arith.constant 0 : index
      %34 = vector.load %arg4[%c0_16, %c0_17] : memref<8x1xf32, #tpu.memory_space<vmem>>, vector<8x1xf32>
      tpu.vector_store %arg4[%c0_16, %c0_17], %33 {strides = array<i32>} : memref<8x1xf32, #tpu.memory_space<vmem>>, vector<8x1xf32>,
    } else {
    }
    return
  }
  func.func @transform_0(%arg0: i32, %arg1: i32) -> (i32, i32) {
    %c0_i32 = arith.constant 0 : i32
    %c0_i32_0 = arith.constant 0 : i32
    return %arg0, %c0_i32 : i32, i32
  }
  func.func @transform_1(%arg0: i32, %arg1: i32) -> (i32, i32) {
    %c0_i32 = arith.constant 0 : i32
    return %arg0, %arg1 : i32, i32
  }
  func.func @transform_2(%arg0: i32, %arg1: i32) -> (i32, i32) {
    %c0_i32 = arith.constant 0 : i32
    %c0_i32_0 = arith.constant 0 : i32
    return %arg0, %c0_i32 : i32, i32
  }
}

</mosaic_0001>

<bundles_post_ra>
// kernel: tpu_custom_call.1
= control target key start
LH: loop header
LB: loop body
LE: loop exit
PB: predicated region body
PF: predicated region fallthrough
CT: control target
= control target key end

     0   :  { %v60_v0 = vmov 0   ;;  %vm36_vm1 = vcmask 7168   ;;  %v61_v2 = vmov 0.0   ;;  %v16_v5 = vlaneseq  ;;  %s102_s0 = inlined_call_operand.vmem [shape: s32[8,1], index: 0, kind: input, shape index: {}]   ;;  %s103_s2 = inlined_call_operand.vmem [shape: f32[8,1], index: 2, kind: output, shape index: {}]   ;;  %s104_s1 = inlined_call_operand.vmem [shape: f32[8,32], index: 1, kind: input, shape index: {}]  }
   0x1   :  { %59 = vset.pattern.permute.xlu0 %v60_v0  ;;  %v12_v1 = vld [vmem:[%s102_s0] sm:$0xff]  ;;  %v62_v9 = vmov 0.0033333334   ;;  %vm27_vm3 = vcmask 261120  }
   0x2   :  { %22 = vperm.xlu0 %59, %v12_v1   ;;  %vm13_vm0 = vcmp.ne.s32.totalorder %v12_v1, 0  ;;  %v17_v6 = vand.u32 127, %v16_v5  ;;  %v11_v8 = vld [vmem:[%s104_s1] sm:$0xff] }
   0x3   :  { %v55_v3 = vsel %vm13_vm0, 1.0, %v61_v2  ;;  %v47_v17 = vmul.f32 0.0033333334, %v11_v8 }
   0x4   :  { %v35_v4 = vmul.f32 -0.66520274, %v55_v3 }
   0x5   :  { %v48_v18 = vmul.f32 %v55_v3, %v47_v17 }
   0x6   :  { %37 = vst.msk [vmem:[%s103_s2] sm:$0xff] %vm36_vm1, %v35_v4 }
   0xd   :  { %v38_v14 = vld [vmem:[%s103_s2] sm:$0xff] }
  0x74   :  { %v23_v7 = vpop.permute.xlu0 %22 }
  0x75   :  { %vm24_vm2 = vcmp.eq.s32.totalorder %v17_v6, %v23_v7 }
  0x76   :  { %v25_v10 = vsel %vm24_vm2, 0.9, %v62_v9 }
  0x77   :  { %v26_v11 = vmul.f32 %v25_v10, %v11_v8 }
  0x79   :  { %v28_v12 = vsel %vm27_vm3, %v26_v11, 0.0 }
  0x7a   :  { %29 = vadd.xlane.f32.xlu0 %v28_v12 }
  0xed   :  { %v30_v13 = vpop.xlane.xlu0 %29 }
  0xee   :  { %v39_v15 = vmul.f32 %v55_v3, %v30_v13 }
  0xf0   :  { %v40_v16 = vsub.f32 %v38_v14, %v39_v15 }
  0xf2   :  { %42 = vst.msk [vmem:[%s103_s2] sm:$0xff] %vm36_vm1, %v40_v16 }
  0xf9   :  { %v46_v19 = vld [vmem:[%s103_s2] sm:$0xff] }
  0xfa   :  { %v49_v20 = vadd.f32 %v48_v18, %v46_v19 }
  0xfc   :  { %50 = vst.msk [vmem:[%s103_s2] sm:$0xff] %vm36_vm1, %v49_v20 }

</bundles_post_ra>
